<compile_context>
chip_gen: v7x
topology: tpu7x:2x2x1
jax: 0.10.0
libtpu: 0.0.40
codegen_flags: <defaults>
</compile_context>

<pallas_src>
import jax
import jax.numpy as jnp
from jax.experimental import pallas as pl
from jax.experimental.pallas import tpu as pltpu

# ---- static config (small, consistent with module __init__) -----------------
B, T = 2, 8
D_M, D_M_A, D_M_V = 32, 24, 16        # text / audio / visual feature widths
HID = 32                               # args.hidesize
NUM_SPEAKERS = 2
N_CLASSES = 4
RATIO_SPEAKER = 0.5
RATIO_MODAL = 0.3
SEQ_LENGTHS = (8, 6)                   # python ints -> static gather
N_NODES = sum(SEQ_LENGTHS)             # 14

D_CAT = D_M_A + D_M_V + D_M            # 72 (concat order: a | v | l)
H3 = 3 * HID                           # 96
LANES = 128                            # padded input / hidden / output lane width
N_PAD = ((N_NODES + 7) // 8) * 8       # 16 (sublane multiple)


# ------------------------------ fused Pallas kernel ---------------------------
def _gnn_fused_kernel(u_ref, spk_ref, w_in_ref, w_fcc_ref, w_head_ref,
                      bias_ref, out_ref):
    """Whole forward on the padded node slab (everything 128-lane dense):
       feat = tanh(U_cat @ W_in + b_in) + spk             [N,128] (lanes 0:96 = a|v|l, 96:128 = 0)
       (MDGAT/MPCAT ~ identity)
       h    = feat @ W_fcc + b_fcc                        [N,128] (lanes 96:128 = fusion hidden, 0:96 = 0)
       cat  = feat + h                                    free lane-concat via VPU add
       out  = cat @ W_head_merged + b_out                 [N,128]
              cols 0:4 = log_prob_a, 4:8 = log_prob_v, 8:12 = log_prob_l, 12:16 = log_prob
       modal-embedding term is pre-folded into b_fcc / b_out.
    """
    biases = bias_ref[...]                      # [8, 128] packed bias slab
    b_in = biases[0:1, :]
    b_fcc = biases[1:2, :]
    b_out = biases[2:3, :]

    feat = jnp.tanh(
        jnp.dot(u_ref[...], w_in_ref[...], preferred_element_type=jnp.float32)
        + b_in) + spk_ref[...]
    h = (jnp.dot(feat, w_fcc_ref[...], preferred_element_type=jnp.float32)
         + b_fcc)
    cat = feat + h                              # lanes 0:96 = feat, 96:128 = h
    out_ref[...] = (
        jnp.dot(cat, w_head_ref[...], preferred_element_type=jnp.float32)
        + b_out)


def _vmem_spec():
    return pl.BlockSpec(memory_space=pltpu.MemorySpace.VMEM)


def fused_forward(u_cat, spk, w_in, w_fcc, w_head, bias_slab):
    return pl.pallas_call(
        _gnn_fused_kernel,
        in_specs=[_vmem_spec() for _ in range(6)],
        out_specs=_vmem_spec(),
        out_shape=jax.ShapeDtypeStruct((N_PAD, LANES), jnp.float32),
    )(u_cat, spk, w_in, w_fcc, w_head, bias_slab)


# ------------------------------- JAX glue -------------------------------------
def gather_nodes(x):
    """batch_graphify / simple_batch_graphify: concat valid timesteps."""
    return jnp.concatenate([x[i, :L] for i, L in enumerate(SEQ_LENGTHS)], axis=0)


def init_params(key):
    ks = jax.random.split(key, 20)
    s = 0.1
    return {
        # per-modal input linears (base_model 'None'): Linear(D_m_x, hidesize)
        "w_a": s * jax.random.normal(ks[0], (D_M_A, HID), jnp.float32),
        "b_a": s * jax.random.normal(ks[1], (1, HID), jnp.float32),
        "w_v": s * jax.random.normal(ks[2], (D_M_V, HID), jnp.float32),
        "b_v": s * jax.random.normal(ks[3], (1, HID), jnp.float32),
        "w_l": s * jax.random.normal(ks[4], (D_M, HID), jnp.float32),
        "b_l": s * jax.random.normal(ks[5], (1, HID), jnp.float32),
        # embeddings
        "spk_emb": s * jax.random.normal(ks[6], (NUM_SPEAKERS, HID), jnp.float32),
        "modal_emb": s * jax.random.normal(ks[7], (3, HID), jnp.float32),
        # per-modal classifiers
        "ws_a": s * jax.random.normal(ks[8], (HID, N_CLASSES), jnp.float32),
        "bs_a": s * jax.random.normal(ks[9], (1, N_CLASSES), jnp.float32),
        "ws_v": s * jax.random.normal(ks[10], (HID, N_CLASSES), jnp.float32),
        "bs_v": s * jax.random.normal(ks[11], (1, N_CLASSES), jnp.float32),
        "ws_l": s * jax.random.normal(ks[12], (HID, N_CLASSES), jnp.float32),
        "bs_l": s * jax.random.normal(ks[13], (1, N_CLASSES), jnp.float32),
        # fusion: fccccc Linear(3*hidesize, hidesize), smax_fc Linear(hidesize, n_classes)
        "w_fcc": s * jax.random.normal(ks[14], (3 * HID, HID), jnp.float32),
        "b_fcc": s * jax.random.normal(ks[15], (1, HID), jnp.float32),
        "w_smax": s * jax.random.normal(ks[16], (HID, N_CLASSES), jnp.float32),
        "b_smax": s * jax.random.normal(ks[17], (1, N_CLASSES), jnp.float32),
    }


def _fuse_params(p):
    """Build the 128-lane-dense fused weights / packed bias slab.

    Folds:
      * block-diagonal input linear (a|v|l)            -> w_in [128,128]
      * fccccc with its output placed at lanes 96:128  -> w_fcc [128,128]
      * per-modal classifiers + smax_fc merged         -> w_head [128,128]
      * ratio_modal * modal_emb contribution           -> into b_fcc / b_out
      * ratio_speaker                                  -> into the speaker table
      * b_in, b_fcc, b_out                             -> one [8,128] slab
    """
    f32 = jnp.float32

    # block-diagonal input linear: rows [a|v|l] -> cols [emo_a|emo_v|emo_l], lanes 96:128 zero
    w_in = jnp.zeros((LANES, LANES), f32)
    w_in = w_in.at[0:D_M_A, 0:HID].set(p["w_a"])
    w_in = w_in.at[D_M_A:D_M_A + D_M_V, HID:2 * HID].set(p["w_v"])
    w_in = w_in.at[D_M_A + D_M_V:D_CAT, 2 * HID:3 * HID].set(p["w_l"])

    b_in = jnp.zeros((1, LANES), f32)
    b_in = b_in.at[:, 0:HID].set(p["b_a"])
    b_in = b_in.at[:, HID:2 * HID].set(p["b_v"])
    b_in = b_in.at[:, 2 * HID:3 * HID].set(p["b_l"])

    # constant modal-embedding row (a|v|l), pre-scaled -> folded into downstream biases
    modal = RATIO_MODAL * p["modal_emb"].reshape(1, H3)                   # [1, 96]

    # fccccc: real columns live at output lanes 96:128
    w_fcc = jnp.zeros((LANES, LANES), f32)
    w_fcc = w_fcc.at[0:H3, H3:H3 + HID].set(p["w_fcc"])
    b_fcc = jnp.zeros((1, LANES), f32)
    b_fcc = b_fcc.at[:, H3:H3 + HID].set(p["b_fcc"] + modal @ p["w_fcc"])

    # merged head: rows 0:96 = per-modal classifiers (block-diag), rows 96:128 = smax_fc
    w_head = jnp.zeros((LANES, LANES), f32)
    w_head = w_head.at[0:HID, 0:N_CLASSES].set(p["ws_a"])
    w_head = w_head.at[HID:2 * HID, N_CLASSES:2 * N_CLASSES].set(p["ws_v"])
    w_head = w_head.at[2 * HID:3 * HID, 2 * N_CLASSES:3 * N_CLASSES].set(p["ws_l"])
    w_head = w_head.at[H3:H3 + HID, 3 * N_CLASSES:4 * N_CLASSES].set(p["w_smax"])

    b_out = jnp.zeros((1, LANES), f32)
    b_out = b_out.at[:, 0:N_CLASSES].set(
        p["bs_a"] + modal[:, 0:HID] @ p["ws_a"])
    b_out = b_out.at[:, N_CLASSES:2 * N_CLASSES].set(
        p["bs_v"] + modal[:, HID:2 * HID] @ p["ws_v"])
    b_out = b_out.at[:, 2 * N_CLASSES:3 * N_CLASSES].set(
        p["bs_l"] + modal[:, 2 * HID:3 * HID] @ p["ws_l"])
    b_out = b_out.at[:, 3 * N_CLASSES:4 * N_CLASSES].set(p["b_smax"])
    # (modal contribution to the fused head flows through b_fcc -> w_smax rows; no double count)

    bias_slab = jnp.zeros((8, LANES), f32)
    bias_slab = bias_slab.at[0:1].set(b_in)
    bias_slab = bias_slab.at[1:2].set(b_fcc)
    bias_slab = bias_slab.at[2:3].set(b_out)

    spk_tbl = RATIO_SPEAKER * p["spk_emb"]                                # [num_speakers, HID]
    return w_in, w_fcc, w_head, bias_slab, spk_tbl


def gnn_forward(params, U, qmask, U_a, U_v):
    # gather valid timesteps per batch element (graphify) and concat modals
    ua = gather_nodes(U_a)                        # [N, D_m_a]
    uv = gather_nodes(U_v)                        # [N, D_m_v]
    ul = gather_nodes(U)                          # [N, D_m]
    qm = gather_nodes(qmask)                      # [N, num_speakers]

    u_cat = jnp.concatenate([ua, uv, ul], axis=-1)                          # [N, 72]
    u_cat = jnp.pad(u_cat, ((0, N_PAD - N_NODES), (0, LANES - D_CAT)))      # [16, 128]

    w_in, w_fcc, w_head, bias_slab, spk_tbl = _fuse_params(params)

    # speaker embedding lookup (embedding gather = glue); table already * ratio_speaker
    spk_idx = jnp.argmax(qm, axis=-1)                                       # [N]
    spk_vec = spk_tbl[spk_idx]                                              # [N, HID]
    spk3 = jnp.tile(spk_vec, (1, 3))                                        # [N, 96]
    spk3 = jnp.pad(spk3, ((0, N_PAD - N_NODES), (0, LANES - H3)))           # [16, 128], lanes 96:128 = 0

    out_pad = fused_forward(u_cat, spk3, w_in, w_fcc, w_head, bias_slab)    # [16, 128]

    # slice the lane-dense slab back into the four heads (drop padded rows/cols)
    log_prob_a = out_pad[:N_NODES, 0:N_CLASSES]
    log_prob_v = out_pad[:N_NODES, N_CLASSES:2 * N_CLASSES]
    log_prob_l = out_pad[:N_NODES, 2 * N_CLASSES:3 * N_CLASSES]
    log_prob = out_pad[:N_NODES, 3 * N_CLASSES:4 * N_CLASSES]
    return log_prob_a, log_prob_v, log_prob_l, log_prob


if __name__ == "__main__":
    key = jax.random.PRNGKey(0)
    kp, k1, k2, k3, k4 = jax.random.split(key, 5)
    params = init_params(kp)

    U = jax.random.normal(k1, (B, T, D_M), jnp.float32)
    U_a = jax.random.normal(k2, (B, T, D_M_A), jnp.float32)
    U_v = jax.random.normal(k3, (B, T, D_M_V), jnp.float32)
    spk = jax.random.randint(k4, (B, T), 0, NUM_SPEAKERS)
    qmask = jax.nn.one_hot(spk, NUM_SPEAKERS, dtype=jnp.float32)  # [B, T, num_speakers]

    outs = jax.jit(gnn_forward)(params, U, qmask, U_a, U_v)
    outs = jax.block_until_ready(outs)

    log_prob_a, log_prob_v, log_prob_l, log_prob = outs
    assert log_prob_a.shape == (N_NODES, N_CLASSES)
    assert log_prob_v.shape == (N_NODES, N_CLASSES)
    assert log_prob_l.shape == (N_NODES, N_CLASSES)
    assert log_prob.shape == (N_NODES, N_CLASSES)
    assert all(bool(jnp.all(jnp.isfinite(o))) for o in outs)
    print("KERNEL_OK")
</pallas_src>

<mosaic_0001>
module attributes {stable_mosaic.version = 11 : i64} {
  func.func @_gnn_fused_kernel(%arg0: memref<16x128xf32, #tpu.memory_space<vmem>>, %arg1: memref<16x128xf32, #tpu.memory_space<vmem>>, %arg2: memref<128x128xf32, #tpu.memory_space<vmem>>, %arg3: memref<128x128xf32, #tpu.memory_space<vmem>>, %arg4: memref<128x128xf32, #tpu.memory_space<vmem>>, %arg5: memref<8x128xf32, #tpu.memory_space<vmem>>, %arg6: memref<16x128xf32, #tpu.memory_space<vmem>>) attributes {dimension_semantics = [], scalar_prefetch = 0 : i64, scratch_operands = 0 : i64, tpu.core_type = #tpu.core_type<tc>} {
    %c0 = arith.constant 0 : index
    %c0_0 = arith.constant 0 : index
    %0 = vector.load %arg5[%c0, %c0_0] : memref<8x128xf32, #tpu.memory_space<vmem>>, vector<8x128xf32>
    %1 = vector.extract_strided_slice %0 {offsets = [0, 0], sizes = [1, 128], strides = [1, 1]} : vector<8x128xf32> to vector<1x128xf32>
    %2 = vector.extract_strided_slice %0 {offsets = [1, 0], sizes = [1, 128], strides = [1, 1]} : vector<8x128xf32> to vector<1x128xf32>
    %3 = vector.extract_strided_slice %0 {offsets = [2, 0], sizes = [1, 128], strides = [1, 1]} : vector<8x128xf32> to vector<1x128xf32>
    %c0_1 = arith.constant 0 : index
    %c0_2 = arith.constant 0 : index
    %4 = vector.load %arg0[%c0_1, %c0_2] : memref<16x128xf32, #tpu.memory_space<vmem>>, vector<16x128xf32>
    %c0_3 = arith.constant 0 : index
    %c0_4 = arith.constant 0 : index
    %5 = vector.load %arg2[%c0_3, %c0_4] : memref<128x128xf32, #tpu.memory_space<vmem>>, vector<128x128xf32>
    %cst = arith.constant dense<0.000000e+00> : vector<16x128xf32>
    %6 = tpu.matmul %4, %5, %cst {dimension_numbers = #tpu.dot_dimension_numbers<[1], [0], [0], [1], [0, 0, 1, 1], [], []>} : vector<16x128xf32>, vector<128x128xf32>, vector<16x128xf32> -> vector<16x128xf32>
    %7 = vector.broadcast %1 : vector<1x128xf32> to vector<16x128xf32>
    %8 = arith.addf %6, %7 : vector<16x128xf32>
    %9 = math.tanh %8 : vector<16x128xf32>
    %c0_5 = arith.constant 0 : index
    %c0_6 = arith.constant 0 : index
    %10 = vector.load %arg1[%c0_5, %c0_6] : memref<16x128xf32, #tpu.memory_space<vmem>>, vector<16x128xf32>
    %11 = arith.addf %9, %10 : vector<16x128xf32>
    %c0_7 = arith.constant 0 : index
    %c0_8 = arith.constant 0 : index
    %12 = vector.load %arg3[%c0_7, %c0_8] : memref<128x128xf32, #tpu.memory_space<vmem>>, vector<128x128xf32>
    %cst_9 = arith.constant dense<0.000000e+00> : vector<16x128xf32>
    %13 = tpu.matmul %11, %12, %cst_9 {dimension_numbers = #tpu.dot_dimension_numbers<[1], [0], [0], [1], [0, 0, 1, 1], [], []>} : vector<16x128xf32>, vector<128x128xf32>, vector<16x128xf32> -> vector<16x128xf32>
    %14 = vector.broadcast %2 : vector<1x128xf32> to vector<16x128xf32>
    %15 = arith.addf %13, %14 : vector<16x128xf32>
    %16 = arith.addf %11, %15 : vector<16x128xf32>
    %c0_10 = arith.constant 0 : index
    %c0_11 = arith.constant 0 : index
    %17 = vector.load %arg4[%c0_10, %c0_11] : memref<128x128xf32, #tpu.memory_space<vmem>>, vector<128x128xf32>
    %cst_12 = arith.constant dense<0.000000e+00> : vector<16x128xf32>
    %18 = tpu.matmul %16, %17, %cst_12 {dimension_numbers = #tpu.dot_dimension_numbers<[1], [0], [0], [1], [0, 0, 1, 1], [], []>} : vector<16x128xf32>, vector<128x128xf32>, vector<16x128xf32> -> vector<16x128xf32>
    %19 = vector.broadcast %3 : vector<1x128xf32> to vector<16x128xf32>
    %20 = arith.addf %18, %19 : vector<16x128xf32>
    %c0_13 = arith.constant 0 : index
    %c0_14 = arith.constant 0 : index
    %21 = vector.load %arg6[%c0_13, %c0_14] : memref<16x128xf32, #tpu.memory_space<vmem>>, vector<16x128xf32>
    tpu.vector_store %arg6[%c0_13, %c0_14], %20 {strides = array<i32>} : memref<16x128xf32, #tpu.memory_space<vmem>>, vector<16x128xf32>,
    return
  }
}

</mosaic_0001>

<bundles_post_ra>
// kernel: tile.9
= control target key start
LH: loop header
LB: loop body
LE: loop exit
PB: predicated region body
PF: predicated region fallthrough
CT: control target
= control target key end

     0   :  { %vm72_vm0 = vcmask 1047556   ;;  %vm81_vm1 = vcmask 1045508   ;;  %s121_s5 = smov 48  ;;  %vm74_vm2 = vcmask 261120   ;;  %s160_s6 = smov 64   ;;  %vm94_vm3 = vcmask 785920   ;;  %s237_s0 = inlined_call_operand.vmem [shape: f32[14,3,32], index: 0, kind: input, shape index: {}]   ;;  %s238_s1 = inlined_call_operand.vmem [shape: f32[14,96], index: 1, kind: output, shape index: {}]  }
   0x1   :  { %v148_v0 = vld [vmem:[%s237_s0 + $0x1c] sm:$0xf]  ;;  %v149_v1 = vld [vmem:[%s237_s0 + $0x18] sm:$0xf]  ;;  %v150_v2 = vld [vmem:[%s237_s0 + $0x14] sm:$0xf] }
   0x2   :  { %38 = vst [vmem:[#allocation0 + $0x38] sm:$0xf] %v148_v0  ;;  %43 = vst [vmem:[#allocation0 + $0x30] sm:$0xf] %v149_v1  ;;  %v151_v3 = vld [vmem:[%s237_s0 + $0x10] sm:$0xf] }
   0x3   :  { %48 = vst [vmem:[#allocation0 + $0x28] sm:$0xf] %v150_v2  ;;  %v152_v4 = vld [vmem:[%s237_s0 + $0xc] sm:$0xf]  ;;  %v153_v5 = vld [vmem:[%s237_s0 + $0x8] sm:$0xf] }
   0x4   :  { %53 = vst [vmem:[#allocation0 + $0x20] sm:$0xf] %v151_v3  ;;  %58 = vst [vmem:[#allocation0 + $0x18] sm:$0xf] %v152_v4  ;;  %v154_v6 = vld [vmem:[%s237_s0 + $0x4] sm:$0xf] }
   0x5   :  { %63 = vst [vmem:[#allocation0 + $0x10] sm:$0xf] %v153_v5  ;;  %v68_v7 = vld [vmem:[%s237_s0] sm:$0xf]  ;;  %67 = vst [vmem:[#allocation0 + $0x8] sm:$0xf] %v154_v6 }
   0x6   :  { %69 = vst [vmem:[#allocation0] sm:$0xf] %v68_v7  ;;  %v142_v8 = vld [vmem:[%s237_s0 + $0x34] sm:$0xf]  ;;  %v143_v9 = vld [vmem:[%s237_s0 + $0x30] sm:$0xf] }
   0x7   :  { %8 = vst [vmem:[#allocation0 + $0x68] sm:$0xf] %v142_v8  ;;  %13 = vst [vmem:[#allocation0 + $0x60] sm:$0xf] %v143_v9  ;;  %v144_v10 = vld [vmem:[%s237_s0 + $0x2c] sm:$0xf] }
   0x8   :  { %v145_v11 = vld [vmem:[%s237_s0 + $0x28] sm:$0xf]  ;;  %v146_v12 = vld [vmem:[%s237_s0 + $0x24] sm:$0xf]  ;;  %18 = vst [vmem:[#allocation0 + $0x58] sm:$0xf] %v144_v10 }
   0x9   :  { %23 = vst [vmem:[#allocation0 + $0x50] sm:$0xf] %v145_v11  ;;  %28 = vst [vmem:[#allocation0 + $0x48] sm:$0xf] %v146_v12  ;;  %v147_v13 = vld [vmem:[%s237_s0 + $0x20] sm:$0xf] }
   0xa   :  { %33 = vst [vmem:[#allocation0 + $0x40] sm:$0xf] %v147_v13  ;;  %s99_s0 = smov 48  ;;  %s79_s7 = smov 48  ;;  %vm116_vm4 = vcmask 523520  }
   0xb   :  { %v89_v14 = vld [vmem:[#allocation0 + $0x2] ss:$8 sm:$0xf0]   ;;  %v111_v15 = vld [vmem:[#allocation0 + $0x1] ss:$8 sm:$0xf0]  }
   0xc   :  { %v71_v20 = vld [vmem:[#allocation0] ss:$8 sm:$0xf0]   ;;  %s161_s8 = smov 32  }
   0xd   :  { %v87_v16 = vld [vmem:[#allocation0 + $0x2] ss:$8 sm:$0xf]   ;;  %v70_v17 = vld [vmem:[#allocation0] ss:$8 sm:$0xf]  }
   0xe   :  { %v91_v18 = vsel %vm72_vm0, %v89_v14, %v87_v16  ;;  %v109_v19 = vld [vmem:[#allocation0 + $0x1] ss:$8 sm:$0xf]   ;;  %v73_v22 = vsel %vm72_vm0, %v71_v20, %v70_v17 }
   0xf   :  { %92 = vrot.lane.b32.xlu0 %v91_v18, %s160_s6  ;;  %v113_v21 = vsel %vm72_vm0, %v111_v15, %v109_v19  ;;  %75 = vst.msk [vmem:[%s238_s1] sm:$0xff] %vm74_vm2, %v73_v22  }
  0x10   :  { %114 = vrot.lane.b32.xlu1 %v113_v21, %s161_s8 }
  0x11   :  { %v97_v23 = vld [vmem:[#allocation0 + $0x42] ss:$8 sm:$0xf]   ;;  %v119_v26 = vld [vmem:[#allocation0 + $0x41] ss:$8 sm:$0xf]  }
  0x12   :  { %v100_v24 = vld [vmem:[#allocation0 + $0x42] ss:$8 sm:%s99_s0]   ;;  %v122_v27 = vld [vmem:[#allocation0 + $0x41] ss:$8 sm:%s121_s5]   ;;  %v80_v30 = vld [vmem:[#allocation0 + $0x40] ss:$8 sm:%s79_s7]  }
  0x13   :  { %v102_v25 = vsel %vm81_vm1, %v100_v24, %v97_v23  ;;  %v124_v28 = vsel %vm81_vm1, %v122_v27, %v119_v26  ;;  %v77_v29 = vld [vmem:[#allocation0 + $0x40] ss:$8 sm:$0xf]  }
  0x14   :  { %103 = vrot.lane.b32.xlu0 %v102_v25, %s160_s6  ;;  %v82_v31 = vsel %vm81_vm1, %v80_v30, %v77_v29  ;;  %125 = vrot.lane.b32.xlu1 %v124_v28, %s161_s8 }
  0x15   :  { %155 = vst.msk [vmem:[%s238_s1 + $0x8] sm:$0x3f] %vm74_vm2, %v82_v31  }
  0x81   :  { %v93_v32 = vpop.permute.xlu0 %92  }
  0x82   :  { %95 = vst.msk [vmem:[%s238_s1] sm:$0xff] %vm94_vm3, %v93_v32   ;;  %v115_v33 = vpop.permute.xlu1 %114  }
  0x83   :  { %117 = vst.msk [vmem:[%s238_s1] sm:$0xff] %vm116_vm4, %v115_v33  }
  0x86   :  { %v104_v34 = vpop.permute.xlu0 %103   ;;  %v126_v35 = vpop.permute.xlu1 %125  }
  0x87   :  { %156 = vst.msk [vmem:[%s238_s1 + $0x8] sm:$0x3f] %vm94_vm3, %v104_v34  }
  0x88   :  { %157 = vst.msk [vmem:[%s238_s1 + $0x8] sm:$0x3f] %vm116_vm4, %v126_v35  }

// kernel: gnn_forward.1
= control target key start
LH: loop header
LB: loop body
LE: loop exit
PB: predicated region body
PF: predicated region fallthrough
CT: control target
= control target key end

     0   :  { %s784_s2 = inlined_call_operand.vmem [shape: f32[128,128], index: 2, kind: input, shape index: {}]   ;;  %s785_s0 = inlined_call_operand.vmem [shape: f32[16,128], index: 0, kind: input, shape index: {}]   ;;  %s786_s3 = inlined_call_operand.vmem [shape: f32[128,128], index: 3, kind: input, shape index: {}]   ;;  %s787_s4 = inlined_call_operand.vmem [shape: f32[128,128], index: 4, kind: input, shape index: {}]   ;;  %s788_s5 = inlined_call_operand.vmem [shape: f32[8,128], index: 5, kind: input, shape index: {}]   ;;  %s789_s1 = inlined_call_operand.vmem [shape: f32[16,128], index: 1, kind: input, shape index: {}]   ;;  %s790_s6 = inlined_call_operand.vmem [shape: f32[16,128], index: 6, kind: output, shape index: {}]  }
   0x1   :  { %v26_v0 = vld [vmem:[%s784_s2] sm:$0xff]  ;;  %v27_v1 = vld [vmem:[%s784_s2 + $0x8] sm:$0xff]  ;;  %v28_v2 = vld [vmem:[%s784_s2 + $0x10] sm:$0xff] }
   0x2   :  { %v484_v3 = vpack.c.bf16 %v27_v1, %v26_v0  ;;  %v29_v4 = vld [vmem:[%s784_s2 + $0x18] sm:$0xff]  ;;  %v30_v6 = vld [vmem:[%s784_s2 + $0x20] sm:$0xff]  ;;  %v31_v7 = vld [vmem:[%s784_s2 + $0x28] sm:$0xff] }
   0x3   :  { %v488_v5 = vpack.c.bf16 %v29_v4, %v28_v2  ;;  %v492_v8 = vpack.c.bf16 %v31_v7, %v30_v6  ;;  %v32_v9 = vld [vmem:[%s784_s2 + $0x30] sm:$0xff]  ;;  %v33_v10 = vld [vmem:[%s784_s2 + $0x38] sm:$0xff]  ;;  %v24_v11 = vld [vmem:[%s785_s0] sm:$0xff]  ;;  %v42_v7 = vlaneseq }
   0x4   :  { %485 = vmatprep.subr.bf16.mxu0 %v484_v3  ;;  %411 = vmatprep.mubr.f32.mxu0 %v24_v11  ;;  %v127_v12 = vld [vmem:[%s786_s3] sm:$0xff]  ;;  %v128_v13 = vld [vmem:[%s786_s3 + $0x8] sm:$0xff]  ;;  %v129_v14 = vld [vmem:[%s786_s3 + $0x10] sm:$0xff]  ;;  %v496_v20 = vpack.c.bf16 %v33_v10, %v32_v9 }
   0x5   :  { %487 = vmatpush3.bf16.msra.mxu0 %v484_v3  ;;  %v516_v15 = vpack.c.bf16 %v128_v13, %v127_v12  ;;  %v130_v16 = vld [vmem:[%s786_s3 + $0x18] sm:$0xff]  ;;  %v131_v18 = vld [vmem:[%s786_s3 + $0x20] sm:$0xff]  ;;  %v132_v19 = vld [vmem:[%s786_s3 + $0x28] sm:$0xff] }
   0x6   :  { %489 = vmatprep.subr.bf16.mxu0 %v488_v5  ;;  %v520_v17 = vpack.c.bf16 %v130_v16, %v129_v14  ;;  %v34_v21 = vld [vmem:[%s784_s2 + $0x40] sm:$0xff]  ;;  %v35_v22 = vld [vmem:[%s784_s2 + $0x48] sm:$0xff]  ;;  %v524_v23 = vpack.c.bf16 %v132_v19, %v131_v18  ;;  %v133_v24 = vld [vmem:[%s786_s3 + $0x30] sm:$0xff] }
   0x7   :  { %517 = vmatprep.subr.bf16.mxu1 %v516_v15  ;;  %v134_v25 = vld [vmem:[%s786_s3 + $0x38] sm:$0xff]  ;;  %v500_v26 = vpack.c.bf16 %v35_v22, %v34_v21  ;;  %v36_v27 = vld [vmem:[%s784_s2 + $0x50] sm:$0xff]  ;;  %v38_v31 = vld [vmem:[%s784_s2 + $0x60] sm:$0xff] }
   0x8   :  { %519 = vmatpush3.bf16.msra.mxu1 %v516_v15  ;;  %v37_v28 = vld [vmem:[%s784_s2 + $0x58] sm:$0xff]  ;;  %v528_v29 = vpack.c.bf16 %v134_v25, %v133_v24  ;;  %v39_v32 = vld [vmem:[%s784_s2 + $0x68] sm:$0xff]  ;;  %v40_v34 = vld [vmem:[%s784_s2 + $0x70] sm:$0xff] }
   0x9   :  { %491 = vmatpush3.bf16.msra.mxu0 %v488_v5  ;;  %521 = vmatprep.subr.bf16.mxu1 %v520_v17  ;;  %v504_v30 = vpack.c.bf16 %v37_v28, %v36_v27  ;;  %v508_v33 = vpack.c.bf16 %v39_v32, %v38_v31  ;;  %v41_v35 = vld [vmem:[%s784_s2 + $0x78] sm:$0xff]  ;;  %v25_v37 = vld [vmem:[%s785_s0 + $0x8] sm:$0xff]  ;;  %v135_v38 = vld [vmem:[%s786_s3 + $0x40] sm:$0xff] }
   0xa   :  { %493 = vmatprep.subr.bf16.mxu0 %v492_v8  ;;  %v512_v36 = vpack.c.bf16 %v41_v35, %v40_v34  ;;  %v136_v39 = vld [vmem:[%s786_s3 + $0x48] sm:$0xff]  ;;  %v137_v41 = vld [vmem:[%s786_s3 + $0x50] sm:$0xff]  ;;  %v138_v42 = vld [vmem:[%s786_s3 + $0x58] sm:$0xff] }
   0xb   :  { %v532_v40 = vpack.c.bf16 %v136_v39, %v135_v38  ;;  %v536_v43 = vpack.c.bf16 %v138_v42, %v137_v41  ;;  %v139_v44 = vld [vmem:[%s786_s3 + $0x60] sm:$0xff]  ;;  %v140_v45 = vld [vmem:[%s786_s3 + $0x68] sm:$0xff]  ;;  %v141_v47 = vld [vmem:[%s786_s3 + $0x70] sm:$0xff] }
   0xc   :  { %523 = vmatpush3.bf16.msra.mxu1 %v520_v17  ;;  %v540_v46 = vpack.c.bf16 %v140_v45, %v139_v44  ;;  %v142_v48 = vld [vmem:[%s786_s3 + $0x78] sm:$0xff]  ;;  %v224_v50 = vld [vmem:[%s787_s4] sm:$0xff]  ;;  %v225_v51 = vld [vmem:[%s787_s4 + $0x8] sm:$0xff] }
   0xd   :  { %495 = vmatpush3.bf16.msra.mxu0 %v492_v8  ;;  %525 = vmatprep.subr.bf16.mxu1 %v524_v23  ;;  %v544_v49 = vpack.c.bf16 %v142_v48, %v141_v47  ;;  %v226_v52 = vld [vmem:[%s787_s4 + $0x10] sm:$0xff]  ;;  %v548_v53 = vpack.c.bf16 %v225_v51, %v224_v50  ;;  %v227_v54 = vld [vmem:[%s787_s4 + $0x18] sm:$0xff]  ;;  %v228_v56 = vld [vmem:[%s787_s4 + $0x20] sm:$0xff]  ;;  %v43_v8 = vshrl.u32 %v42_v7, 7 }
   0xe   :  { %497 = vmatprep.subr.bf16.mxu0 %v496_v20  ;;  %v552_v55 = vpack.c.bf16 %v227_v54, %v226_v52  ;;  %v229_v57 = vld [vmem:[%s787_s4 + $0x28] sm:$0xff]  ;;  %v230_v59 = vld [vmem:[%s787_s4 + $0x30] sm:$0xff]  ;;  %v231_v60 = vld [vmem:[%s787_s4 + $0x38] sm:$0xff] }
   0xf   :  { %v556_v58 = vpack.c.bf16 %v229_v57, %v228_v56  ;;  %v560_v61 = vpack.c.bf16 %v231_v60, %v230_v59  ;;  %v232_v62 = vld [vmem:[%s787_s4 + $0x40] sm:$0xff]  ;;  %v233_v63 = vld [vmem:[%s787_s4 + $0x48] sm:$0xff]  ;;  %v234_v1 = vld [vmem:[%s787_s4 + $0x50] sm:$0xff]  ;;  %v44_v9 = vsub.s32 0, %v43_v8  ;;  %v145_v25 = vsub.s32 1, %v43_v8 }
  0x10   :  { %527 = vmatpush3.bf16.msra.mxu1 %v524_v23  ;;  %v564_v0 = vpack.c.bf16 %v233_v63, %v232_v62  ;;  %v235_v2 = vld [vmem:[%s787_s4 + $0x58] sm:$0xff]  ;;  %v236_v4 = vld [vmem:[%s787_s4 + $0x60] sm:$0xff]  ;;  %v237_v5 = vld [vmem:[%s787_s4 + $0x68] sm:$0xff] }
  0x11   :  { %499 = vmatpush3.bf16.msra.mxu0 %v496_v20  ;;  %529 = vmatprep.subr.bf16.mxu1 %v528_v29  ;;  %v568_v3 = vpack.c.bf16 %v235_v2, %v234_v1  ;;  %v572_v6 = vpack.c.bf16 %v237_v5, %v236_v4  ;;  %v23_v10 = vld [vmem:[%s788_s5] sm:$0xff]  ;;  %v124_v18 = vld [vmem:[%s789_s1 + $0x8] sm:$0xff]  ;;  %v238_v22 = vld [vmem:[%s787_s4 + $0x70] sm:$0xff] }
  0x12   :  { %501 = vmatprep.subr.bf16.mxu0 %v500_v26  ;;  %v45_v11 = vrot.slane %v23_v10, %v44_v9  ;;  %v123_v16 = vld [vmem:[%s789_s1] sm:$0xff]  ;;  %v239_v23 = vld [vmem:[%s787_s4 + $0x78] sm:$0xff] }
  0x13   :  { %v576_v24 = vpack.c.bf16 %v239_v23, %v238_v22 }
  0x14   :  { %531 = vmatpush3.bf16.msra.mxu1 %v528_v29 }
  0x15   :  { %503 = vmatpush3.bf16.msra.mxu0 %v500_v26  ;;  %533 = vmatprep.subr.bf16.mxu1 %v532_v40  ;;  %v146_v26 = vrot.slane %v23_v10, %v145_v25 }
  0x16   :  { %505 = vmatprep.subr.bf16.mxu0 %v504_v30 }
  0x18   :  { %535 = vmatpush3.bf16.msra.mxu1 %v532_v40 }
  0x19   :  { %507 = vmatpush3.bf16.msra.mxu0 %v504_v30  ;;  %537 = vmatprep.subr.bf16.mxu1 %v536_v43 }
  0x1a   :  { %509 = vmatprep.subr.bf16.mxu0 %v508_v33 }
  0x1c   :  { %539 = vmatpush3.bf16.msra.mxu1 %v536_v43 }
  0x1d   :  { %511 = vmatpush3.bf16.msra.mxu0 %v508_v33  ;;  %541 = vmatprep.subr.bf16.mxu1 %v540_v46  ;;  %v242_v33 = vsub.s32 2, %v43_v8 }
  0x1e   :  { %513 = vmatprep.subr.bf16.mxu0 %v512_v36 }
  0x1f   :  { %v243_v34 = vrot.slane %v23_v10, %v242_v33 }
  0x20   :  { %543 = vmatpush3.bf16.msra.mxu1 %v540_v46 }
  0x21   :  { %515 = vmatpush3.bf16.msra.mxu0 %v512_v36  ;;  %545 = vmatprep.subr.bf16.mxu1 %v544_v49 }
  0x22   :  { %549 = vmatprep.subr.bf16.mxu0 %v548_v53 }
  0x24   :  { %412 = vmatmul.mubr.f32.vlgmr.msra.gmra.mrb[0].mxu0 %v25_v37  ;;  %547 = vmatpush3.bf16.msra.mxu1 %v544_v49 }
  0x25   :  { %551 = vmatpush3.bf16.msra.mxu0 %v548_v53 }
  0x26   :  { %553 = vmatprep.subr.bf16.mxu0 %v552_v55 }
  0x29   :  { %555 = vmatpush3.bf16.msra.mxu0 %v552_v55 }
  0x2a   :  { %557 = vmatprep.subr.bf16.mxu0 %v556_v58 }
  0x2d   :  { %559 = vmatpush3.bf16.msra.mxu0 %v556_v58 }
  0x2e   :  { %561 = vmatprep.subr.bf16.mxu0 %v560_v61 }
  0x31   :  { %563 = vmatpush3.bf16.msra.mxu0 %v560_v61 }
  0x32   :  { %565 = vmatprep.subr.bf16.mxu0 %v564_v0 }
  0x35   :  { %567 = vmatpush3.bf16.msra.mxu0 %v564_v0 }
  0x36   :  { %569 = vmatprep.subr.bf16.mxu0 %v568_v3 }
  0x39   :  { %571 = vmatpush3.bf16.msra.mxu0 %v568_v3 }
  0x3a   :  { %573 = vmatprep.subr.bf16.mxu0 %v572_v6 }
  0x3d   :  { %575 = vmatpush3.bf16.msra.mxu0 %v572_v6 }
  0x3e   :  { %577 = vmatprep.subr.bf16.mxu0 %v576_v24 }
  0x41   :  { %579 = vmatpush3.bf16.msra.mxu0 %v576_v24 }
  0xf7   :  { %v413_v12 = vpop.f32.mrb[0].mxu0 }
  0xf8   :  { %v118_v13 = vadd.f32 %v413_v12, %v45_v11  ;;  %v112_v14 = vpop.f32.mrb[1].mxu0 }
  0xf9   :  { %v113_v15 = vadd.f32 %v112_v14, %v45_v11 }
  0xfa   :  { %580 = vtanh.f32 %v118_v13 }
  0xfb   :  { %582 = vtanh.f32 %v113_v15 }
 0x104   :  { %v581_v17 = vpop.eup %580 }
 0x105   :  { %v583_v19 = vpop.eup %582  ;;  %v126_v21 = vadd.f32 %v581_v17, %v124_v18 }
 0x106   :  { %v125_v20 = vadd.f32 %v583_v19, %v123_v16 }
 0x108   :  { %446 = vmatprep.mubr.f32.mxu1 %v125_v20 }
 0x109   :  { %447 = vmatmul.mubr.f32.vlgmr.msra.gmra.mrb[0].mxu1 %v126_v21 }
 0x1dc   :  { %v448_v27 = vpop.f32.mrb[0].mxu1 }
 0x1dd   :  { %v219_v28 = vadd.f32 %v448_v27, %v146_v26  ;;  %v213_v29 = vpop.f32.mrb[1].mxu1 }
 0x1de   :  { %v214_v30 = vadd.f32 %v213_v29, %v146_v26 }
 0x1df   :  { %v223_v32 = vadd.f32 %v219_v28, %v126_v21 }
 0x1e0   :  { %v222_v31 = vadd.f32 %v214_v30, %v125_v20 }
 0x1e2   :  { %481 = vmatprep.mubr.f32.mxu0 %v222_v31 }
 0x1e3   :  { %482 = vmatmul.mubr.f32.vlgmr.msra.gmra.mrb[2].mxu0 %v223_v32 }
 0x2b6   :  { %v483_v35 = vpop.f32.mrb[2].mxu0 }
 0x2b7   :  { %v316_v36 = vadd.f32 %v483_v35, %v243_v34  ;;  %v310_v37 = vpop.f32.mrb[3].mxu0 }
 0x2b8   :  { %v311_v38 = vadd.f32 %v310_v37, %v243_v34 }
 0x2b9   :  { %320 = vst [vmem:[%s790_s6 + $0x8] sm:$0xff] %v316_v36 }
 0x2ba   :  { %319 = vst [vmem:[%s790_s6] sm:$0xff] %v311_v38 }

</bundles_post_ra>
